<compile_context>
chip_gen: v5e
topology: v5e:2x2
jax: 0.10.0
libtpu: 0.0.40
codegen_flags: <defaults>
</compile_context>

<pallas_src>
import math

import jax
import jax.numpy as jnp
from jax.experimental import pallas as pl
from jax.experimental.pallas import tpu as pltpu


def _timestep_embedding_kernel(t_ref, freq_ref, w1_ref, b1_ref, w2_ref, b2_ref,
                               o_ref):
    # t_ref: (TB, 1) f32, freq_ref: (1, half_dim) f32
    ang = t_ref[...] * freq_ref[...]                          # (TB, half_dim) f32

    # sinusoidal embedding, lane-concat -> single (TB, C/4) MXU operand
    emb = jnp.concatenate([jnp.sin(ang), jnp.cos(ang)], axis=1)

    # linear1 (bf16 MXU inputs, f32 accumulate) + bias in f32
    h = b1_ref[...] + jnp.dot(emb.astype(jnp.bfloat16), w1_ref[...],
                              preferred_element_type=jnp.float32)  # (TB, C) f32

    # Swish: exp + approx reciprocal both go to the EUP slot
    h = h * pl.reciprocal(1.0 + jnp.exp(-h), approx=True)

    # linear2 (bf16 MXU inputs, f32 accumulate) + bias in f32
    o_ref[...] = b2_ref[...] + jnp.dot(h.astype(jnp.bfloat16), w2_ref[...],
                                       preferred_element_type=jnp.float32)


def timestep_embedding_pallas(t, params, *, n_channels, block_b=None):
    """t: (B,) f32 timesteps -> (B, n_channels) f32 embedding."""
    B = t.shape[0]
    C = n_channels
    half_dim = C // 8
    quarter = C // 4

    # --- glue: constants / weight repacking (plain JAX, runs once) ----------
    scale = -math.log(10000.0) / (half_dim - 1)
    freq = jnp.exp(jnp.arange(half_dim, dtype=jnp.float32) * scale)
    freq = freq.reshape(1, half_dim)

    # transposed weights as bf16 MXU operands; biases stay f32
    w1t = jnp.transpose(params["linear1_w"]).astype(jnp.bfloat16)   # (C//4, C)
    b1 = params["linear1_b"].reshape(1, C).astype(jnp.float32)
    w2t = jnp.transpose(params["linear2_w"]).astype(jnp.bfloat16)   # (C, C)
    b2 = params["linear2_b"].reshape(1, C).astype(jnp.float32)

    # --- batch tiling --------------------------------------------------------
    # Large tile (few grid steps, full MXU rows) but keep >= 2 grid steps when
    # the batch allows it so the "parallel" axis can use both v7x TensorCores.
    Bp8 = ((B + 7) // 8) * 8
    if block_b is not None:
        TB = block_b
    elif Bp8 <= 8:
        TB = Bp8
    else:
        TB = min(256, max(8, ((Bp8 // 2) // 8) * 8))
    Bp = ((Bp8 + TB - 1) // TB) * TB

    t2 = t.reshape(B, 1).astype(jnp.float32)
    if Bp != B:
        t2 = jnp.pad(t2, ((0, Bp - B), (0, 0)))

    # constant index_maps: weight blocks never change across the batch grid,
    # so they stay resident in VMEM (no per-step re-DMA needed).
    const = lambda shape: pl.BlockSpec(shape, lambda i: (0,) * len(shape))

    cost = pl.CostEstimate(
        flops=2 * Bp * quarter * C + 2 * Bp * C * C,
        transcendentals=Bp * (2 * half_dim + C),
        bytes_accessed=(Bp * 4 + half_dim * 4 + quarter * C * 2 + C * 4
                        + C * C * 2 + C * 4 + Bp * C * 4),
    )

    out = pl.pallas_call(
        _timestep_embedding_kernel,
        out_shape=jax.ShapeDtypeStruct((Bp, C), jnp.float32),
        grid_spec=pltpu.PrefetchScalarGridSpec(
            num_scalar_prefetch=0,
            grid=(Bp // TB,),
            in_specs=[
                pl.BlockSpec((TB, 1), lambda i: (i, 0)),   # t
                const((1, half_dim)),                      # freq table
                const((quarter, C)),                       # W1^T (bf16)
                const((1, C)),                             # b1
                const((C, C)),                             # W2^T (bf16)
                const((1, C)),                             # b2
            ],
            out_specs=pl.BlockSpec((TB, C), lambda i: (i, 0)),
        ),
        compiler_params=pltpu.CompilerParams(
            dimension_semantics=("parallel",)),
        cost_estimate=cost,
    )(t2, freq, w1t, b1, w2t, b2)

    return out[:B]


# ---------------- pure-JAX reference (mirrors the PyTorch forward) ----------
def timestep_embedding_ref(t, params, *, n_channels):
    half_dim = n_channels // 8
    scale = math.log(10000.0) / (half_dim - 1)
    freq = jnp.exp(jnp.arange(half_dim, dtype=jnp.float32) * -scale)
    ang = t[:, None] * freq[None, :]
    emb = jnp.concatenate([jnp.sin(ang), jnp.cos(ang)], axis=1)
    h = emb @ params["linear1_w"].T + params["linear1_b"]
    h = h * jax.nn.sigmoid(h)
    return h @ params["linear2_w"].T + params["linear2_b"]


if __name__ == "__main__":
    B = 16
    n_channels = 128            # lane-dense output (multiple of 128)
    quarter = n_channels // 4   # linear1 input features

    key = jax.random.PRNGKey(0)
    ks = jax.random.split(key, 8)

    def rnd(k, shape, scale=0.1):
        return (scale * jax.random.normal(k, shape)).astype(jnp.float32)

    params = {
        "linear1_w": rnd(ks[0], (n_channels, quarter)),
        "linear1_b": rnd(ks[1], (n_channels,)),
        "linear2_w": rnd(ks[2], (n_channels, n_channels)),
        "linear2_b": rnd(ks[3], (n_channels,)),
    }

    # realistic DDPM timestep magnitudes (both paths use f32 sin/cos)
    t = jax.random.uniform(ks[4], (B,), minval=0.0, maxval=1000.0,
                           dtype=jnp.float32)

    out = timestep_embedding_pallas(t, params, n_channels=n_channels)
    out = jax.block_until_ready(out)

    ref = timestep_embedding_ref(t, params, n_channels=n_channels)
    assert out.shape == (B, n_channels)
    # bf16 MXU inputs + approx reciprocal -> loosened tolerance vs f32 reference
    assert jnp.allclose(out, ref, rtol=2e-2, atol=2e-2), (
        float(jnp.max(jnp.abs(out - ref))))

    # TODO(synk): at B~16 this op is launch/latency bound (~4 MFLOP); the real
    # next step is fusing it into a consumer kernel rather than more tuning.

    print("KERNEL_OK")
</pallas_src>

<mosaic_0001>
module attributes {stable_mosaic.version = 11 : i64} {
  func.func @_timestep_embedding_kernel(%arg0: i32, %arg1: memref<8x1xf32, #tpu.memory_space<vmem>>, %arg2: memref<1x16xf32, #tpu.memory_space<vmem>>, %arg3: memref<32x128xbf16, #tpu.memory_space<vmem>>, %arg4: memref<1x128xf32, #tpu.memory_space<vmem>>, %arg5: memref<128x128xbf16, #tpu.memory_space<vmem>>, %arg6: memref<1x128xf32, #tpu.memory_space<vmem>>, %arg7: memref<8x128xf32, #tpu.memory_space<vmem>>) attributes {dimension_semantics = [#tpu.dimension_semantics<parallel>], iteration_bounds = array<i64: 2>, scalar_prefetch = 0 : i64, scratch_operands = 0 : i64, tpu.core_type = #tpu.core_type<tc>, window_params = [{transform_indices = @transform_0, window_bounds = array<i64: 8, 1>}, {pipeline_mode = #tpu.pipeline_mode<synchronous>, transform_indices = @transform_1, window_bounds = array<i64: 1, 16>}, {pipeline_mode = #tpu.pipeline_mode<synchronous>, transform_indices = @transform_2, window_bounds = array<i64: 32, 128>}, {pipeline_mode = #tpu.pipeline_mode<synchronous>, transform_indices = @transform_3, window_bounds = array<i64: 1, 128>}, {pipeline_mode = #tpu.pipeline_mode<synchronous>, transform_indices = @transform_4, window_bounds = array<i64: 128, 128>}, {pipeline_mode = #tpu.pipeline_mode<synchronous>, transform_indices = @transform_5, window_bounds = array<i64: 1, 128>}, {transform_indices = @transform_6, window_bounds = array<i64: 8, 128>}]} {
    %c0 = arith.constant 0 : index
    %c0_0 = arith.constant 0 : index
    %0 = vector.load %arg1[%c0, %c0_0] : memref<8x1xf32, #tpu.memory_space<vmem>>, vector<8x1xf32>
    %c0_1 = arith.constant 0 : index
    %c0_2 = arith.constant 0 : index
    %1 = vector.load %arg2[%c0_1, %c0_2] : memref<1x16xf32, #tpu.memory_space<vmem>>, vector<1x16xf32>
    %2 = vector.broadcast %0 : vector<8x1xf32> to vector<8x16xf32>
    %3 = vector.broadcast %1 : vector<1x16xf32> to vector<8x16xf32>
    %4 = arith.mulf %2, %3 : vector<8x16xf32>
    %5 = math.sin %4 : vector<8x16xf32>
    %6 = math.cos %4 : vector<8x16xf32>
    %7 = tpu.concatenate %5, %6 in 1 : vector<8x16xf32>, vector<8x16xf32> -> vector<8x32xf32>
    %c0_3 = arith.constant 0 : index
    %c0_4 = arith.constant 0 : index
    %8 = vector.load %arg4[%c0_3, %c0_4] : memref<1x128xf32, #tpu.memory_space<vmem>>, vector<1x128xf32>
    %9 = arith.truncf %7 : vector<8x32xf32> to vector<8x32xbf16>
    %c0_5 = arith.constant 0 : index
    %c0_6 = arith.constant 0 : index
    %10 = vector.load %arg3[%c0_5, %c0_6] : memref<32x128xbf16, #tpu.memory_space<vmem>>, vector<32x128xbf16>
    %cst = arith.constant dense<0.000000e+00> : vector<8x128xf32>
    %11 = tpu.matmul %9, %10, %cst {dimension_numbers = #tpu.dot_dimension_numbers<[1], [0], [0], [1], [0, 0, 1, 1], [], []>} : vector<8x32xbf16>, vector<32x128xbf16>, vector<8x128xf32> -> vector<8x128xf32>
    %12 = vector.broadcast %8 : vector<1x128xf32> to vector<8x128xf32>
    %13 = arith.addf %12, %11 : vector<8x128xf32>
    %cst_7 = arith.constant 0.000000e+00 : f32
    %14 = vector.broadcast %cst_7 : f32 to vector<8x128xf32>
    %15 = arith.subf %14, %13 : vector<8x128xf32>
    %16 = math.exp %15 : vector<8x128xf32>
    %cst_8 = arith.constant 1.000000e+00 : f32
    %17 = vector.broadcast %cst_8 : f32 to vector<8x128xf32>
    %18 = arith.addf %17, %16 : vector<8x128xf32>
    %19 = tpu.reciprocal %18 {approx = true} : vector<8x128xf32> -> vector<8x128xf32>
    %20 = arith.mulf %13, %19 : vector<8x128xf32>
    %c0_9 = arith.constant 0 : index
    %c0_10 = arith.constant 0 : index
    %21 = vector.load %arg6[%c0_9, %c0_10] : memref<1x128xf32, #tpu.memory_space<vmem>>, vector<1x128xf32>
    %22 = arith.truncf %20 : vector<8x128xf32> to vector<8x128xbf16>
    %c0_11 = arith.constant 0 : index
    %c0_12 = arith.constant 0 : index
    %23 = vector.load %arg5[%c0_11, %c0_12] : memref<128x128xbf16, #tpu.memory_space<vmem>>, vector<128x128xbf16>
    %cst_13 = arith.constant dense<0.000000e+00> : vector<8x128xf32>
    %24 = tpu.matmul %22, %23, %cst_13 {dimension_numbers = #tpu.dot_dimension_numbers<[1], [0], [0], [1], [0, 0, 1, 1], [], []>} : vector<8x128xbf16>, vector<128x128xbf16>, vector<8x128xf32> -> vector<8x128xf32>
    %25 = vector.broadcast %21 : vector<1x128xf32> to vector<8x128xf32>
    %26 = arith.addf %25, %24 : vector<8x128xf32>
    %c0_14 = arith.constant 0 : index
    %c0_15 = arith.constant 0 : index
    %27 = vector.load %arg7[%c0_14, %c0_15] : memref<8x128xf32, #tpu.memory_space<vmem>>, vector<8x128xf32>
    tpu.vector_store %arg7[%c0_14, %c0_15], %26 {strides = array<i32>} : memref<8x128xf32, #tpu.memory_space<vmem>>, vector<8x128xf32>,
    return
  }
  func.func @transform_0(%arg0: i32) -> (i32, i32) {
    %c0_i32 = arith.constant 0 : i32
    %c0_i32_0 = arith.constant 0 : i32
    return %arg0, %c0_i32 : i32, i32
  }
  func.func @transform_1(%arg0: i32) -> (i32, i32) {
    %c0_i32 = arith.constant 0 : i32
    %c0_i32_0 = arith.constant 0 : i32
    %c0_i32_1 = arith.constant 0 : i32
    return %c0_i32, %c0_i32_0 : i32, i32
  }
  func.func @transform_2(%arg0: i32) -> (i32, i32) {
    %c0_i32 = arith.constant 0 : i32
    %c0_i32_0 = arith.constant 0 : i32
    %c0_i32_1 = arith.constant 0 : i32
    return %c0_i32, %c0_i32_0 : i32, i32
  }
  func.func @transform_3(%arg0: i32) -> (i32, i32) {
    %c0_i32 = arith.constant 0 : i32
    %c0_i32_0 = arith.constant 0 : i32
    %c0_i32_1 = arith.constant 0 : i32
    return %c0_i32, %c0_i32_0 : i32, i32
  }
  func.func @transform_4(%arg0: i32) -> (i32, i32) {
    %c0_i32 = arith.constant 0 : i32
    %c0_i32_0 = arith.constant 0 : i32
    %c0_i32_1 = arith.constant 0 : i32
    return %c0_i32, %c0_i32_0 : i32, i32
  }
  func.func @transform_5(%arg0: i32) -> (i32, i32) {
    %c0_i32 = arith.constant 0 : i32
    %c0_i32_0 = arith.constant 0 : i32
    %c0_i32_1 = arith.constant 0 : i32
    return %c0_i32, %c0_i32_0 : i32, i32
  }
  func.func @transform_6(%arg0: i32) -> (i32, i32) {
    %c0_i32 = arith.constant 0 : i32
    %c0_i32_0 = arith.constant 0 : i32
    return %arg0, %c0_i32 : i32, i32
  }
}

</mosaic_0001>

<bundles_post_ra>
// kernel: tpu_custom_call.1
= control target key start
LH: loop header
LB: loop body
LE: loop exit
PB: predicated region body
PF: predicated region fallthrough
CT: control target
= control target key end

     0   :  { %11 = vsyncpa [#allocation3], 0  ;;  %s1249_s0 = inlined_call_operand.vmem [shape: f32[16,1], index: 0, kind: input, shape index: {}]   ;;  %s1250_s1 = inlined_call_operand.vmem [shape: f32[1,16], index: 1, kind: input, shape index: {}]   ;;  %s1251_s2 = inlined_call_operand.vmem [shape: bf16[32,128], index: 2, kind: input, shape index: {}]   ;;  %s1252_s3 = inlined_call_operand.vmem [shape: f32[1,128], index: 3, kind: input, shape index: {}]   ;;  %s1253_s4 = inlined_call_operand.hbm [shape: bf16[128,128], index: 4, kind: input, shape index: {}]   ;;  %s1254_s5 = inlined_call_operand.vmem [shape: f32[1,128], index: 5, kind: input, shape index: {}]   ;;  %s1255_s6 = inlined_call_operand.hbm [shape: f32[16,128], index: 6, kind: output, shape index: {}]  }
   0x1   :  { %12 = vsyncpa [#allocation4], 0 }
   0x2   :  { %14 = vsyncpa [#allocation4 + $0x1], 0  ;;  %s1088_s21 = smov 0   ;;  %s1090_s22 = smov 0  }
   0x3   :  { %s1092_s23 = smov 0   ;;  %s1094_s24 = smov 0  }
   0x4 LB: > { %s1109_s25 = sadd.s32 4294967295, %s1040_s24   ;;  %s807_s26 = sadd.s32 4294967294, %s1040_s24   ;;  %s1040_s24 = sphi %s1094_s24, %s1261_s24   ;;  %s1036_s23 = sphi %s1092_s23, %s1260_s23   ;;  %s1032_s22 = sphi %s1090_s22, %s1259_s22   ;;  %s1028_s21 = sphi %s1088_s21, %s1258_s21  }
   0x5   : > { %s1113_s27 = sadd.s32 1, %s1040_s24   ;;  %s158_s28 = sadd.s32 1, %s1036_s23 }
   0x6   : > { %s155_s29 = ssub.s32 %s1040_s24, %s1113_s27  ;;  %p168_p0 = scmp.ne.s32.totalorder %s1036_s23, %s1032_s22 }
   0x7   : > { %p156_p1 = scmp.eq.s32.totalorder %s155_s29, 0  ;;  %p169_p2 = scmp.eq.s32.totalorder %s1109_s25, 1 }
   0x8   : > { %p174_p3 = scmp.ne.s32.totalorder %s1032_s22, %s1028_s21  ;;  %p175_p4 = scmp.eq.s32.totalorder %s807_s26, 1 }
   0x9   : > { %s1124_s30 = scalar_select %p156_p1, %s1036_s23, %s158_s28  }
   0xa   : > { %p1126_p5 = por %p169_p2, %p168_p0  ;;  %p1130_p6 = por %p175_p4, %p174_p3 }
   0xb   : > { %p808_p7 = scmp.ge.s32.totalorder %s1040_s24, 1  ;;  %p182_p8 = scmp.lt.s32.totalorder %s1040_s24, 3 }
   0xc   : > { %p890_p9 = scmp.eq.s32.totalorder %s1109_s25, 0  ;;  %s202_s11 = sshll.u32 %s1253_s4, 4  ;;  %s203_s11 = int_to_ptr.hbm [resolvable:$true] %s202_s11 }
   0xd   : > { %p183_p10 = pnand %p808_p7, %p182_p8  ;;  %s1042_s12 = smov [#allocation2]  }
   0xe   : > { %s204_s13 = sshll.u32 %s1042_s12, 4  ;;  %s1043_s14 = smov 64   ;;  %s205_s13 = int_to_ptr.vmem [resolvable:$true] %s204_s13 }
   0xf   : > { %p882_p11 = pneg %p183_p10  ;;  %s1044_s15 = smov 4  }
  0x10   : > { %230 = sbr.rel (%p183_p10) target bundleno = 646 (0x286), region = 44 }
  0x11   : > { %p883_p12 = pnand %p890_p9, %p882_p11 }
  0x13   : > { %885 = dma.hbm_to_vmem [thread:$0]  (!%p883_p12), %s203_s11, 1024, %s205_s13, [#allocation3], %s1043_s14, %s1043_s14, %s1044_s15  }
  0x15   : > { %1019 = dma.done.wait (%p890_p9), [#allocation3], 1024  }
  0x16   : > { %1021 = vsyncadd (%p890_p9), [#allocation3], 4294966272  ;;  %p260_p13 = scmp.lt.s32.totalorder %s1109_s25, 1  ;;  %v1045_v0 = vmov 0   ;;  %v937_v2 = vld [vmem:[%s1250_s1] ss:$0 sm:$0xff] }
  0x17   : > { %936 = vset.pattern.permute.xlu0 %v1045_v0  ;;  %v1046_v16 = vmov 683565275   ;;  %v1047_v18 = vmov 2475754826   ;;  %v1048_v20 = vmov 2131351028  }
  0x18   : > { %s261_s16 = scalar_select %p260_p13, %s1109_s25, 1  ;;  %v1049_v22 = vmov 2102212464   ;;  %v1050_v27 = vmov 920167782  }
  0x19   : > { %v1051_v30 = vmov 1326507024   ;;  %s1052_s10 = smov 16   ;;  %s257_s15 = sand.u32 1, %s1032_s22  }
  0x1a   : > { %s814_s17 = sshll.u32 %s261_s16, 3  ;;  %s863_s16 = sshll.u32 %s1109_s25, 3 }
  0x1b   : > { %s263_s20 = scalar_lea.vmem %s1249_s0, %s814_s17  ;;  %s813_s17 = sshll.u32 %s257_s15, 3 }
  0x1c   : > { %v265_v1 = vld [vmem:[%s263_s20] sm:$0xff]  ;;  %s731_s20 = scalar_lea.hbm %s1255_s6, %s863_s16  ;;  %s259_s29 = scalar_lea.vmem [#allocation5], %s813_s17 }
  0x1d   : > { %269 = vperm.xlu0 %936, %v265_v1   ;;  %s733_s9 = sshll.u32 %s259_s29, 4  ;;  %s721_s11 = scalar_lea.sflag [#allocation4], %s257_s15  ;;  %s734_s9 = int_to_ptr.vmem [resolvable:$true] %s733_s9 }
  0x1e   : > { %s994_s16 = scalar_lea.hbm %s1255_s6, 16 }
  0x8f   : > { %v270_v3 = vpop.permute.xlu0 %269 }
  0x90   : > { %v1155_v4 = vmul.f32 %v937_v2, %v270_v3 }
  0x92   : > { %v279_v5 = vand.u32 2139095040, %v1155_v4  ;;  %v276_v7 = vand.u32 2147483647, %v1155_v4  ;;  %vm278_vm12 = vcmp.lt.s32.totalorder %v1155_v4, 0 }
  0x94   : > { %v280_v6 = vshrl.u32 %v279_v5, 23  ;;  %v283_v10 = vand.u32 8388607, %v276_v7  ;;  %vm277_vm13 = vcmp.le.f32.partialorder %v276_v7, 0.7853982 }
  0x96   : > { %v815_v8 = vadd.s32 4294967169, %v280_v6  ;;  %v284_v13 = vor.u32 8388608, %v283_v10 }
  0x98   : > { %v286_v9 = vadd.s32 1, %v815_v8  ;;  %v1163_v32 = vshll.u32 %v284_v13, 8 }
  0x9a   : > { %vm287_vm0 = vcmp.gt.s32.totalorder %v286_v9, 0  ;;  %v325_v44 = vand.u32 65535, %v1163_v32  ;;  %v326_v46 = vshrl.u32 %v1163_v32, 16 }
  0x9b   : > { %v288_v11 = vsel %vm287_vm0, %v286_v9, 0 }
  0x9c   : > { %v290_v12 = vand.u32 31, %v288_v11  ;;  %v1161_v14 = vshrl.u32 %v288_v11, 5 }
  0x9e   : > { %v291_v15 = vsub.s32 32, %v290_v12  ;;  %v293_v17 = vshll.u32 %v1046_v16, %v290_v12  ;;  %v296_v19 = vshll.u32 %v1047_v18, %v290_v12  ;;  %v299_v21 = vshll.u32 %v1048_v20, %v290_v12 }
  0x9f   : > { %v302_v23 = vshll.u32 %v1049_v22, %v290_v12  ;;  %v305_v29 = vshll.u32 %v1050_v27, %v290_v12  ;;  %vm308_vm1 = vcmp.lt.s32.totalorder %v1161_v14, 1  ;;  %vm311_vm2 = vcmp.lt.s32.totalorder %v1161_v14, 4 }
  0xa0   : > { %v294_v24 = vshrl.u32 %v1047_v18, %v291_v15  ;;  %v297_v25 = vshrl.u32 %v1048_v20, %v291_v15  ;;  %v300_v26 = vshrl.u32 %v1049_v22, %v291_v15  ;;  %v303_v28 = vshrl.u32 %v1050_v27, %v291_v15 }
  0xa1   : > { %v306_v31 = vshrl.u32 %v1051_v30, %v291_v15  ;;  %vm310_vm3 = vcmp.lt.s32.totalorder %v1161_v14, 3  ;;  %vm309_vm4 = vcmp.lt.s32.totalorder %v1161_v14, 2  ;;  %v292_v9 = vshrl.u32 %v1046_v16, %v291_v15 }
  0xa2   : > { %v295_v33 = vor.u32 %v294_v24, %v293_v17  ;;  %v298_v34 = vor.u32 %v297_v25, %v296_v19  ;;  %v301_v35 = vor.u32 %v300_v26, %v299_v21  ;;  %v304_v36 = vor.u32 %v303_v28, %v302_v23 }
  0xa3   : > { %v307_v37 = vor.u32 %v306_v31, %v305_v29 }
  0xa4   : > { %v316_v38 = vsel %vm308_vm1, %v295_v33, %v298_v34  ;;  %v317_v39 = vsel %vm311_vm2, %v304_v36, 920167782  ;;  %v320_v40 = vsel %vm308_vm1, %v298_v34, %v301_v35  ;;  %v313_v5 = vsel %vm311_vm2, %v301_v35, 2102212464 }
  0xa5   : > { %v318_v41 = vsel %vm310_vm3, %v301_v35, %v317_v39  ;;  %v321_v42 = vsel %vm311_vm2, %v307_v37, 1326507024  ;;  %v312_v18 = vsel %vm308_vm1, %v292_v9, %v295_v33  ;;  %v314_v19 = vsel %vm310_vm3, %v298_v34, %v313_v5 }
  0xa6   : > { %v322_v43 = vsel %vm310_vm3, %v304_v36, %v321_v42  ;;  %v319_v45 = vsel %vm309_vm4, %v316_v38, %v318_v41  ;;  %v315_v16 = vsel %vm309_vm4, %v312_v18, %v314_v19 }
  0xa7   : > { %v323_v47 = vsel %vm309_vm4, %v320_v40, %v322_v43  ;;  %v349_v48 = vand.u32 65535, %v319_v45  ;;  %v350_v49 = vshrl.u32 %v319_v45, 16  ;;  %v369_v28 = vmul.u32 %v1163_v32, %v315_v16  ;;  %v866_v16 = vld [vmem:[%s1251_s2] sm:$0xff] }
  0xa8   : > { %v327_v50 = vand.u32 65535, %v323_v47  ;;  %v328_v51 = vshrl.u32 %v323_v47, 16  ;;  %v867_v47 = vld [vmem:[%s1251_s2 + $0x8] sm:$0xff]  ;;  %vm419_vm4 = vweird.f32 %v1155_v4 }
  0xa9   : > { %v352_v52 = vmul.u32 %v350_v49, %v325_v44  ;;  %v353_v53 = vmul.u32 %v349_v48, %v326_v46  ;;  %v351_v56 = vmul.u32 %v349_v48, %v325_v44  ;;  %v354_v60 = vmul.u32 %v350_v49, %v326_v46  ;;  %619 = vmatpush.bf16.msra.mxu0 %v867_v47 }
  0xaa   : > { %v330_v54 = vmul.u32 %v328_v51, %v325_v44  ;;  %v331_v55 = vmul.u32 %v327_v50, %v326_v46  ;;  %v329_v58 = vmul.u32 %v327_v50, %v325_v44  ;;  %v332_v61 = vmul.u32 %v328_v51, %v326_v46 }
  0xab   : > { %v355_v57 = vshll.u32 %v352_v52, 16  ;;  %v357_v62 = vshll.u32 %v353_v53, 16  ;;  %v356_v13 = vshrl.u32 %v352_v52, 16  ;;  %v358_v22 = vshrl.u32 %v353_v53, 16 }
  0xac   : > { %v333_v59 = vshll.u32 %v330_v54, 16  ;;  %v335_v1 = vshll.u32 %v331_v55, 16  ;;  %v334_v20 = vshrl.u32 %v330_v54, 16  ;;  %v336_v24 = vshrl.u32 %v331_v55, 16 }
  0xad   : > { %vm359_vm5 = vc.u32 %v351_v56, %v355_v57  ;;  %v361_v63 = vadd.s32 %v355_v57, %v351_v56  ;;  %620 = vmatpush.bf16.msra.mxu0 %v866_v16 }
  0xae   : > { %vm337_vm6 = vc.u32 %v329_v58, %v333_v59  ;;  %v339_v2 = vadd.s32 %v333_v59, %v329_v58  ;;  %v360_v3 = vsel %vm359_vm5, 1, %v1045_v0  ;;  %vm589_vm5 = vcmask 130048  }
  0xaf   : > { %v338_v6 = vsel %vm337_vm6, 1, %v1045_v0  ;;  %v362_v8 = vadd.s32 %v360_v3, %v354_v60  ;;  %vm363_vm7 = vc.u32 %v361_v63, %v357_v62  ;;  %vm609_vm6 = vcmask 261120  }
  0xb0   : > { %v340_v10 = vadd.s32 %v338_v6, %v332_v61  ;;  %vm341_vm8 = vc.u32 %v339_v2, %v335_v1  ;;  %v364_v11 = vsel %vm363_vm7, 1, %v1045_v0 }
  0xb1   : > { %v342_v12 = vsel %vm341_vm8, 1, %v1045_v0  ;;  %v366_v17 = vadd.s32 %v364_v11, %v362_v8  ;;  %v365_v0 = vadd.s32 %v361_v63, %v357_v62 }
  0xb2   : > { %v344_v21 = vadd.s32 %v342_v12, %v340_v10 }
  0xb3   : > { %v367_v23 = vadd.s32 %v366_v17, %v356_v13 }
  0xb4   : > { %v345_v15 = vadd.s32 %v344_v21, %v334_v20 }
  0xb5   : > { %v368_v25 = vadd.s32 %v367_v23, %v358_v22 }
  0xb6   : > { %v346_v26 = vadd.s32 %v345_v15, %v336_v24 }
  0xb7   : > { %v372_v27 = vadd.s32 1, %v368_v25 }
  0xb8   : > { %vm371_vm9 = vc.u32 %v346_v26, %v365_v0  ;;  %v370_v40 = vadd.s32 %v365_v0, %v346_v26 }
  0xb9   : > { %v373_v29 = vsel %vm371_vm9, %v372_v27, %v368_v25  ;;  %v875_v25 = vld [vmem:[#allocation2 + $0x38] sm:$0xff] }
  0xba   : > { %v374_v30 = vadd.s32 %v373_v29, %v369_v28  ;;  %702 = vmatpush.bf16.msra.mxu1 %v875_v25  ;;  %v873_v28 = vld [vmem:[#allocation2 + $0x28] sm:$0xff]  ;;  %v872_v29 = vld [vmem:[#allocation2 + $0x20] sm:$0xff] }
  0xbc   : > { %v375_v31 = vadd.s32 536870912, %v374_v30 }
  0xbe   : > { %v376_v33 = vshrl.u32 %v375_v31, 30  ;;  %v870_v31 = vld [vmem:[#allocation2 + $0x10] sm:$0xff] }
  0xc0   : > { %v377_v34 = vshll.u32 %v376_v33, 30  ;;  %v400_v53 = vsub.s32 4, %v376_v33 }
  0xc2   : > { %v378_v35 = vsub.s32 %v374_v30, %v377_v34  ;;  %v401_v57 = vsel %vm278_vm12, %v400_v53, %v376_v33  ;;  %v871_v30 = vld [vmem:[#allocation2 + $0x18] sm:$0xff]  ;;  %v869_v33 = vld [vmem:[#allocation2 + $0x8] sm:$0xff]  ;;  %v868_v34 = vld [vmem:[#allocation2] sm:$0xff] }
  0xc3   : > { %v403_v60 = vsel %vm277_vm13, 0, %v401_v57 }
  0xc4   : > { %vm379_vm10 = vcmp.lt.s32.totalorder %v378_v35, 0  ;;  %v380_v36 = vsub.s32 0, %v378_v35  ;;  %v420_v2 = vadd.s32 3, %v403_v60  ;;  %v575_v11 = vand.u32 3, %v403_v60 }
  0xc6   : > { %v381_v37 = vsel %vm379_vm10, %v380_v36, %v378_v35  ;;  %v421_v9 = vand.u32 3, %v420_v2  ;;  %vm576_vm0 = vcmp.lt.s32.totalorder %v575_v11, 2  ;;  %vm577_vm1 = vcmp.eq.s32.totalorder %v575_v11, 0 }
  0xc7   : > { %v382_v38 = vclz %v381_v37  ;;  %vm580_vm2 = vcmp.eq.s32.totalorder %v575_v11, 2 }
  0xc8   : > { %vm426_vm14 = vcmp.eq.s32.totalorder %v421_v9, 2  ;;  %vm423_vm15 = vcmp.eq.s32.totalorder %v421_v9, 0  ;;  %vm422_vm3 = vcmp.lt.s32.totalorder %v421_v9, 2 }
  0xc9   : > { %v816_v39 = vadd.s32 4294967294, %v382_v38 }
  0xcb   : > { %vm817_vm11 = vcmp.lt.s32.totalorder %v816_v39, 0 }
  0xcc   : > { %v385_v14 = vsel %vm817_vm11, 0, %v816_v39 }
  0xcd   : > { %v386_v41 = vsub.s32 32, %v385_v14  ;;  %v390_v42 = vsub.s32 4294967266, %v385_v14  ;;  %v387_v43 = vshll.u32 %v378_v35, %v385_v14  ;;  %v938_v35 = vld [vmem:[%s1252_s3] ss:$0 sm:$0xff] }
  0xcf   : > { %v388_v44 = vshrl.u32 %v370_v40, %v386_v41  ;;  %v391_v32 = vadd.s32 127, %v390_v42 }
  0xd1   : > { %v389_v45 = vor.u32 %v388_v44, %v387_v43  ;;  %v392_v46 = vshll.u32 %v391_v32, 23  ;;  %v939_v32 = vld [vmem:[%s1254_s5] ss:$0 sm:$0xff] }
  0xd3   : > { %v393_v48 = vor.u32 4788187, %v392_v46  ;;  %v396_v50 = vcvt.s32.f32 %v389_v45 }
  0xd5   : > { %v394_v49 = vand.u32 2147483647, %v393_v48 }
  0xd7   : > { %v397_v51 = vmul.f32 %v396_v50, %v394_v49 }
  0xd9   : > { %v398_v52 = vxor.u32 2147483648, %v397_v51 }
  0xdb   : > { %v399_v54 = vsel %vm278_vm12, %v398_v52, %v397_v51 }
  0xdc   : > { %v402_v55 = vsel %vm277_vm13, %v1155_v4, %v399_v54  ;;  %v874_v4 = vld [vmem:[#allocation2 + $0x30] sm:$0xff] }
  0xdd   : > { %v404_v56 = vmul.f32 %v402_v55, %v402_v55  ;;  %703 = vmatpush.bf16.msra.mxu1 %v874_v4 }
  0xdf   : > { %v405_v58 = vmul.f32 -0.001358992, %v404_v56  ;;  %v412_v59 = vmul.f32 -0.00019511016, %v404_v56 }
  0xe1   : > { %v406_v61 = vadd.f32 0.041655596, %v405_v58  ;;  %v413_v62 = vadd.f32 0.008332121, %v412_v59  ;;  %704 = vmatpush.bf16.msra.mxu1 %v873_v28 }
  0xe3   : > { %v407_v63 = vmul.f32 %v406_v61, %v404_v56  ;;  %v414_v1 = vmul.f32 %v413_v62, %v404_v56 }
  0xe5   : > { %v408_v3 = vadd.f32 -0.4999988, %v407_v63  ;;  %v415_v5 = vadd.f32 -0.16666654, %v414_v1  ;;  %705 = vmatpush.bf16.msra.mxu1 %v872_v29 }
  0xe7   : > { %v409_v6 = vmul.f32 %v408_v3, %v404_v56  ;;  %v416_v8 = vmul.f32 %v415_v5, %v404_v56 }
  0xe9   : > { %v410_v10 = vadd.f32 1.0, %v409_v6  ;;  %v417_v7 = vadd.f32 1.0, %v416_v8  ;;  %706 = vmatpush.bf16.msra.mxu1 %v871_v30 }
  0xeb   : > { %v418_v12 = vmul.f32 %v417_v7, %v402_v55  ;;  %v427_v13 = vxor.u32 2147483648, %v410_v10 }
  0xed   : > { %v424_v17 = vxor.u32 2147483648, %v418_v12  ;;  %v428_v18 = vsel %vm426_vm14, %v427_v13, %v418_v12  ;;  %v582_v20 = vsel %vm580_vm2, %v427_v13, %v418_v12  ;;  %707 = vmatpush.bf16.msra.mxu1 %v870_v31 }
  0xef   : > { %v579_v19 = vsel %vm577_vm1, %v410_v10, %v424_v17  ;;  %v425_v21 = vsel %vm423_vm15, %v410_v10, %v424_v17 }
  0xf0   : > { %v583_v22 = vsel %vm576_vm0, %v579_v19, %v582_v20  ;;  %v429_v23 = vsel %vm422_vm3, %v425_v21, %v428_v18 }
  0xf1   : > { %v584_v24 = vsel %vm419_vm4, nan, %v583_v22  ;;  %v430_v15 = vsel %vm419_vm4, nan, %v429_v23  ;;  %708 = vmatpush.bf16.msra.mxu1 %v869_v33 }
  0xf2   : > { %586 = vrot.lane.b32.xlu0 %v584_v24, %s1052_s10  ;;  %s735_s10 = sshll.u32 %s731_s20, 4  ;;  %s736_s10 = int_to_ptr.hbm [resolvable:$true] %s735_s10 }
  0xf3   : > { %s988_s25 = sshra.s32 %s736_s10, 4  ;;  %s989_s25 = int_to_ptr.hbm [resolvable:$true] %s988_s25 }
  0xf4   : > { %s990_s12 = scalar_lea.hbm %s989_s25, 8  ;;  %p995_p3 = scmp.lt.s32.totalorder %s989_s25, %s1255_s6 }
  0xf5   : > { %709 = vmatpush.bf16.msra.mxu1 %v868_v34  ;;  %p991_p0 = scmp.ne.s32.totalorder %s989_s25, %s990_s12  ;;  %p996_p4 = scmp.lt.s32.totalorder %s994_s16, %s990_s12 }
  0xf7   : > { %p992_p1 = pnand %p991_p0, %p1126_p5  ;;  %p997_p7 = por %p996_p4, %p995_p3 }
  0xf9   : > { %p993_p2 = pneg %p992_p1 }
  0xfb   : > { %p998_p8 = pnand %p997_p7, %p993_p2 }
 0x164   : > { %v587_v26 = vpop.permute.xlu0 %586 }
 0x165   : > { %v590_v0 = vsel %vm589_vm5, %v430_v15, %v587_v26 }
 0x166   : > { %v592_v27 = vpack.c.bf16 %v590_v0, %v590_v0 }
 0x168   : > { %829 = vmatmul.msk.bf16.vlgmr.msra.gmra.mxu0 %vm609_vm6, %v592_v27 }
 0x1e5   : > { %v622_v36 = vpop.f32.mrf.mxu0 }
 0x1e6   : > { %v629_v37 = vadd.f32 %v938_v35, %v622_v36 }
 0x1e8   : > { %v630_v38 = vsub.f32 0.0, %v629_v37 }
 0x1ea   : > { %v631_v39 = vmul.f32 1.442695, %v630_v38 }
 0x1ec   : > { %940 = vpow2.f32 %v631_v39 }
 0x1ed   : > { %v624_v14 = vpop.f32.mrf.mxu0 }
 0x1f2   : > { %v941_v40 = vpop.eup %940 }
 0x1f3   : > { %v633_v41 = vadd.f32 1.0, %v941_v40 }
 0x1f5   : > { %942 = vrcp.f32 %v633_v41 }
 0x1fb   : > { %v943_v42 = vpop.eup %942 }
 0x1fc   : > { %v635_v43 = vmul.f32 %v943_v42, %v629_v37 }
 0x1fe   : > { %v637_v44 = vpack.c.bf16 %v635_v43, %v635_v43 }
 0x200   : > { %710 = vmatmul.bf16.vlgmr.msra.gmra.mxu1 %v637_v44 }
 0x27d   : > { %v711_v45 = vpop.f32.mrf.mxu1 }
 0x27e   : > { %v718_v46 = vadd.f32 %v939_v32, %v711_v45 }
 0x280   : > { %719 = vst [vmem:[%s259_s29] sm:$0xff] %v718_v46 }
 0x281   : > { %1001 = shalt.err (!%p998_p8)
}
 0x282   : > { %880 = dma.vmem_to_hbm [thread:$0]  (%p1126_p5), %s734_s9, 128, %s736_s10, %s721_s11  }
 0x285   : > { %v713_v47 = vpop.f32.mrf.mxu1 }
 0x286 PF: > { %p892_p9 = scmp.ge.s32.totalorder %s1040_s24, 2  ;;  %s747_s15 = sand.u32 1, %s1028_s21  }
 0x287   : > { %s748_s19 = scalar_lea.sflag [#allocation4], %s747_s15 }
 0x288   : > { %p887_p10 = pnand %p892_p9, %p1130_p6 }
 0x28a   : > { %p888_p11 = pneg %p887_p10 }
 0x28c   : > { %1023 = dma.done.wait (%p888_p11), %s748_s19, 128  }
 0x28d   : > { %1025 = vsyncadd (%p888_p11), %s748_s19, 4294967168  ;;  %p17_p12 = scmp.ge.s32.totalorder %s1113_s27, 4   ;;  %s1258_s21 = smov %s1032_s22 }
 0x28e   : > { %s1259_s22 = smov %s1036_s23  ;;  %s1260_s23 = smov %s1124_s30 }
 0x28f   : > { %s1261_s24 = smov %s1113_s27  ;;  %19 = sbr.rel (!%p17_p12) target bundleno = 4 (0x4), region = 84 }
 0x294   :  { %754 = vsyncpa [#allocation3], 1 }
 0x295   :  { %756 = vsyncpa [#allocation3 + $0x1], 1 }
 0x296   :  { %757 = vsyncpa [#allocation4], 1 }
 0x297   :  { %759 = vsyncpa [#allocation4 + $0x1], 1 }

</bundles_post_ra>
